<compile_context>
chip_gen: v7x
topology: tpu7x:2x2x1
jax: 0.10.0
libtpu: 0.0.40
codegen_flags: <defaults>
</compile_context>

<pallas_src>
import functools
import math

import jax
import jax.numpy as jnp
from jax.experimental import pallas as pl
from jax.experimental.pallas import tpu as pltpu


def _round_up(x, m):
    return ((x + m - 1) // m) * m


def _vmem_capacity_bytes():
    """Per-core physical VMEM (128 MiB v5e/v6e, 64 MiB v7x)."""
    try:
        return int(pltpu.get_tpu_info().vmem_capacity_bytes)
    except Exception:
        return 64 * 1024 * 1024  # conservative fallback = v7x


# ------------------------------ kernels ------------------------------------ #
def _resident_kernel(x_ref, w0_ref, b0_ref, *rest, n_rest, compute_dtype):
    """All layers in one grid step; all weights resident in VMEM.

    x_ref : (tm, in_dim)          activations (input dtype)
    w0_ref: (in_dim, h_dim)       layer-0 weight (compute_dtype)
    b0_ref: (1, h_dim)            layer-0 bias (f32)
    rest  : [ws_ref (n_rest,h,h), bs_ref (n_rest,1,h)] if n_rest else []
            followed by o_ref (tm, h_dim)
    """
    o_ref = rest[-1]
    y = jnp.dot(x_ref[...].astype(compute_dtype), w0_ref[...],
                preferred_element_type=jnp.float32)
    y = jnp.maximum(y + b0_ref[...], 0.0)
    if n_rest:
        ws_ref, bs_ref = rest[0], rest[1]
        for l in range(n_rest):                       # static unroll over layers
            y = jnp.dot(y.astype(compute_dtype), ws_ref[l],
                        preferred_element_type=jnp.float32)
            y = jnp.maximum(y + bs_ref[l], 0.0)
    o_ref[...] = y.astype(o_ref.dtype)


def _streamed_kernel(x_ref, w0_ref, b0_ref, ws_ref, bs_ref, o_ref, y_ref, *,
                     compute_dtype):
    """One layer per grid step along axis 1; deep-layer weights are streamed.

    The activation tile is carried across the 'arbitrary' layer axis in the
    f32 VMEM scratch y_ref; the output block is written on the last layer.
    """
    l = pl.program_id(1)
    n = pl.num_programs(1)

    @pl.when(l == 0)
    def _():
        y = jnp.dot(x_ref[...].astype(compute_dtype), w0_ref[...],
                    preferred_element_type=jnp.float32)
        y_ref[...] = jnp.maximum(y + b0_ref[...], 0.0)

    @pl.when(l > 0)
    def _():
        y = jnp.dot(y_ref[...].astype(compute_dtype), ws_ref[0],
                    preferred_element_type=jnp.float32)
        y_ref[...] = jnp.maximum(y + bs_ref[0], 0.0)

    @pl.when(l == n - 1)
    def _():
        o_ref[...] = y_ref[...].astype(o_ref.dtype)


# ------------------------------ wrapper ------------------------------------ #
def conv1x1_relu_stack(x2d, w0, b0, ws, bs, *, compute_dtype=jnp.bfloat16,
                       tm=1024, force_stream=False):
    """Fused stack of Conv1d(kernel=1)+ReLU layers.

    x2d: (M, in_dim) input-dtype    w0: (in_dim, h) compute_dtype   b0: (1, h) f32
    ws : (n_rest, h, h) compute_dtype or None    bs: (n_rest, 1, h) f32 or None
    returns (M, h) in x2d.dtype
    """
    M, in_dim = x2d.shape
    h_dim = w0.shape[1]
    n_rest = 0 if ws is None else ws.shape[0]
    n_layers = n_rest + 1

    isz_x = x2d.dtype.itemsize
    isz_c = jnp.dtype(compute_dtype).itemsize

    w_bytes = w0.size * w0.dtype.itemsize + b0.size * b0.dtype.itemsize
    if ws is not None:
        w_bytes += ws.size * ws.dtype.itemsize + bs.size * bs.dtype.itemsize

    cap = _vmem_capacity_bytes()
    budget = (cap * 7) // 10        # headroom for Mosaic temporaries / spills
    vmem_limit = (cap * 3) // 4     # ~96 MiB on v5e/v6e, ~48 MiB on v7x

    # Per-row VMEM of one row tile: double-buffered input + output plus the
    # in-kernel f32 / compute-dtype activation copies.
    per_row = (2 * in_dim * isz_x          # x (double-buffered)
               + 2 * h_dim * isz_x         # out (double-buffered)
               + 2 * h_dim * 4             # f32 intermediates
               + 2 * max(in_dim, h_dim) * isz_c)

    use_stream = force_stream and n_rest > 0
    if not use_stream and n_rest > 0:
        # Constant-index weight blocks are still double-buffered by the
        # pipeline; stream layers when they would not comfortably fit.
        use_stream = 2 * w_bytes > budget // 2

    if use_stream:
        fixed = (2 * (w0.size * w0.dtype.itemsize + b0.size * 4)
                 + 2 * (h_dim * h_dim * isz_c + h_dim * 4))   # one streamed layer
        tm_fit = (budget - fixed) // max(per_row + h_dim * 4, 1)  # + f32 scratch
    else:
        fixed = 2 * w_bytes
        tm_fit = (budget - fixed) // max(per_row, 1)

    # Tile rows: multiple of 8, capped by request / budget / problem size,
    # then balanced so the ragged last block is not mostly padding.
    tm_eff = max(8, min(int(tm), int(tm_fit), _round_up(M, 8)))
    tm_eff = (tm_eff // 8) * 8
    n_tiles = pl.cdiv(M, tm_eff)
    tm_eff = _round_up(pl.cdiv(M, n_tiles), 8)
    n_tiles = pl.cdiv(M, tm_eff)

    cost = pl.CostEstimate(
        flops=2 * M * (in_dim * h_dim + n_rest * h_dim * h_dim),
        transcendentals=0,
        bytes_accessed=M * in_dim * isz_x + M * h_dim * isz_x + w_bytes,
    )
    out_shape = jax.ShapeDtypeStruct((M, h_dim), x2d.dtype)

    if not use_stream:
        in_specs = [
            pl.BlockSpec((tm_eff, in_dim), lambda i: (i, 0)),
            pl.BlockSpec((in_dim, h_dim), lambda i: (0, 0)),       # resident
            pl.BlockSpec((1, h_dim), lambda i: (0, 0)),            # resident
        ]
        args = [x2d, w0, b0]
        if n_rest > 0:
            in_specs += [
                pl.BlockSpec((n_rest, h_dim, h_dim), lambda i: (0, 0, 0)),
                pl.BlockSpec((n_rest, 1, h_dim), lambda i: (0, 0, 0)),
            ]
            args += [ws, bs]
        return pl.pallas_call(
            functools.partial(_resident_kernel, n_rest=n_rest,
                              compute_dtype=compute_dtype),
            out_shape=out_shape,
            grid=(n_tiles,),
            in_specs=in_specs,
            out_specs=pl.BlockSpec((tm_eff, h_dim), lambda i: (i, 0)),
            compiler_params=pltpu.CompilerParams(
                dimension_semantics=("parallel",),
                vmem_limit_bytes=int(vmem_limit),
            ),
            cost_estimate=cost,
        )(*args)

    # Layer-streaming fallback: grid (row_tile, layer); weights of layer l+1
    # are prefetched while layer l's matmul runs; activation carried in VMEM.
    return pl.pallas_call(
        functools.partial(_streamed_kernel, compute_dtype=compute_dtype),
        out_shape=out_shape,
        grid=(n_tiles, n_layers),
        in_specs=[
            pl.BlockSpec((tm_eff, in_dim), lambda i, l: (i, 0)),
            pl.BlockSpec((in_dim, h_dim), lambda i, l: (0, 0)),
            pl.BlockSpec((1, h_dim), lambda i, l: (0, 0)),
            pl.BlockSpec((1, h_dim, h_dim),
                         lambda i, l: (jnp.maximum(l - 1, 0), 0, 0)),
            pl.BlockSpec((1, 1, h_dim),
                         lambda i, l: (jnp.maximum(l - 1, 0), 0, 0)),
        ],
        out_specs=pl.BlockSpec((tm_eff, h_dim), lambda i, l: (i, 0)),
        scratch_shapes=[pltpu.VMEM((tm_eff, h_dim), jnp.float32)],
        compiler_params=pltpu.CompilerParams(
            dimension_semantics=("parallel", "arbitrary"),
            vmem_limit_bytes=int(vmem_limit),
        ),
        cost_estimate=cost,
    )(x2d, w0, b0, ws, bs)


# -------------------------- Module-level wrapper --------------------------- #
class ConvolutionalPallas:
    """Pallas equivalent of the PyTorch `Convolutional` module (kernel=1)."""

    def __init__(self, in_dim, h_dim, n_layers, dropout=0.2, drop_out=0.0,
                 kernel=1, compute_dtype=jnp.bfloat16, seed=0):
        assert kernel == 1, "only the default kernel=1 is implemented"
        self.in_dim, self.h_dim, self.n_layers = in_dim, h_dim, n_layers
        self.compute_dtype = compute_dtype

        key = jax.random.PRNGKey(seed)
        dims = [in_dim] + [h_dim] * n_layers
        self.params = []                 # f32 reference params, matmul layout
        for layer in range(n_layers):
            cin, cout = dims[layer], dims[layer + 1]
            key, kw, kb = jax.random.split(key, 3)
            # PyTorch Conv1d default init: U(-1/sqrt(fan_in), 1/sqrt(fan_in)).
            bound = 1.0 / math.sqrt(cin * kernel)
            # Conv1d weight is (cout, cin, 1); store its (cin, cout) matmul form.
            w = jax.random.uniform(kw, (cin, cout), jnp.float32,
                                   minval=-bound, maxval=bound)
            b = jax.random.uniform(kb, (1, cout), jnp.float32,
                                   minval=-bound, maxval=bound)
            self.params.append((w, b))

        # Kernel-ready params: layer 0 separate (unpadded K = in_dim), layers
        # 1..n-1 stacked.  Weights in the MXU compute dtype; biases stay f32
        # (bias + ReLU run in f32 in the kernel).
        w0, b0 = self.params[0]
        self.w0 = w0.astype(compute_dtype)
        self.b0 = b0
        if n_layers > 1:
            self.ws = jnp.stack([w for w, _ in self.params[1:]], 0).astype(compute_dtype)
            self.bs = jnp.stack([b for _, b in self.params[1:]], 0)
        else:
            self.ws = None
            self.bs = None

    def __call__(self, src, *, tm=1024, force_stream=False):
        # src: (B, L, in_dim) -- matches the PyTorch forward's input layout.
        B, L, in_dim = src.shape
        assert in_dim == self.in_dim
        x = src.reshape(B * L, in_dim)
        y = conv1x1_relu_stack(x, self.w0, self.b0, self.ws, self.bs,
                               compute_dtype=self.compute_dtype,
                               tm=tm, force_stream=force_stream)
        return y.reshape(B, L, self.h_dim)


# --------------------------------- main ------------------------------------ #
if __name__ == "__main__":
    B, L, in_dim, h_dim, n_layers = 2, 16, 8, 32, 2

    key = jax.random.PRNGKey(0)
    src = jax.random.normal(key, (B, L, in_dim), dtype=jnp.float32)

    model = ConvolutionalPallas(in_dim, h_dim, n_layers, kernel=1, seed=0)

    out = jax.block_until_ready(model(src))                           # resident
    out_stream = jax.block_until_ready(model(src, force_stream=True))  # streamed

    # Pure-JAX reference with the same bf16-input / f32-accumulate math.
    y = src.reshape(B * L, in_dim)
    for w, b in model.params:
        y = jnp.dot(y.astype(model.compute_dtype), w.astype(model.compute_dtype),
                    preferred_element_type=jnp.float32)
        y = jnp.maximum(y + b, 0.0)
    ref = y.reshape(B, L, h_dim)

    assert out.shape == (B, L, h_dim)
    assert jnp.allclose(out, ref, atol=1e-3, rtol=1e-3)
    assert jnp.allclose(out_stream, ref, atol=1e-3, rtol=1e-3)
    print("KERNEL_OK")
</pallas_src>

<mosaic_0001>
module attributes {stable_mosaic.version = 11 : i64} {
  func.func @_resident_kernel(%arg0: i32, %arg1: memref<32x8xf32, #tpu.memory_space<vmem>>, %arg2: memref<8x32xbf16, #tpu.memory_space<vmem>>, %arg3: memref<1x32xf32, #tpu.memory_space<vmem>>, %arg4: memref<1x32x32xbf16, #tpu.memory_space<vmem>>, %arg5: memref<1x1x32xf32, #tpu.memory_space<vmem>>, %arg6: memref<32x32xf32, #tpu.memory_space<vmem>>) attributes {dimension_semantics = [#tpu.dimension_semantics<parallel>], iteration_bounds = array<i64: 1>, scalar_prefetch = 0 : i64, scratch_operands = 0 : i64, tpu.core_type = #tpu.core_type<tc>, window_params = [{transform_indices = @transform_0, window_bounds = array<i64: 32, 8>}, {pipeline_mode = #tpu.pipeline_mode<synchronous>, transform_indices = @transform_1, window_bounds = array<i64: 8, 32>}, {pipeline_mode = #tpu.pipeline_mode<synchronous>, transform_indices = @transform_2, window_bounds = array<i64: 1, 32>}, {pipeline_mode = #tpu.pipeline_mode<synchronous>, transform_indices = @transform_3, window_bounds = array<i64: 1, 32, 32>}, {pipeline_mode = #tpu.pipeline_mode<synchronous>, transform_indices = @transform_4, window_bounds = array<i64: 1, 1, 32>}, {transform_indices = @transform_5, window_bounds = array<i64: 32, 32>}]} {
    %c0 = arith.constant 0 : index
    %c0_0 = arith.constant 0 : index
    %0 = vector.load %arg1[%c0, %c0_0] : memref<32x8xf32, #tpu.memory_space<vmem>>, vector<32x8xf32>
    %1 = arith.truncf %0 : vector<32x8xf32> to vector<32x8xbf16>
    %c0_1 = arith.constant 0 : index
    %c0_2 = arith.constant 0 : index
    %2 = vector.load %arg2[%c0_1, %c0_2] : memref<8x32xbf16, #tpu.memory_space<vmem>>, vector<8x32xbf16>
    %cst = arith.constant dense<0.000000e+00> : vector<32x32xf32>
    %3 = tpu.matmul %1, %2, %cst {dimension_numbers = #tpu.dot_dimension_numbers<[1], [0], [0], [1], [0, 0, 1, 1], [], []>} : vector<32x8xbf16>, vector<8x32xbf16>, vector<32x32xf32> -> vector<32x32xf32>
    %c0_3 = arith.constant 0 : index
    %c0_4 = arith.constant 0 : index
    %4 = vector.load %arg3[%c0_3, %c0_4] : memref<1x32xf32, #tpu.memory_space<vmem>>, vector<1x32xf32>
    %5 = vector.broadcast %4 : vector<1x32xf32> to vector<32x32xf32>
    %6 = arith.addf %3, %5 : vector<32x32xf32>
    %cst_5 = arith.constant 0.000000e+00 : f32
    %7 = vector.broadcast %cst_5 : f32 to vector<32x32xf32>
    %8 = arith.maximumf %6, %7 : vector<32x32xf32>
    %9 = arith.truncf %8 : vector<32x32xf32> to vector<32x32xbf16>
    %c0_6 = arith.constant 0 : index
    %c0_7 = arith.constant 0 : index
    %c0_8 = arith.constant 0 : index
    %10 = vector.load %arg4[%c0_6, %c0_7, %c0_8] : memref<1x32x32xbf16, #tpu.memory_space<vmem>>, vector<1x32x32xbf16>
    %11 = vector.shape_cast %10 : vector<1x32x32xbf16> to vector<32x32xbf16>
    %cst_9 = arith.constant dense<0.000000e+00> : vector<32x32xf32>
    %12 = tpu.matmul %9, %11, %cst_9 {dimension_numbers = #tpu.dot_dimension_numbers<[1], [0], [0], [1], [0, 0, 1, 1], [], []>} : vector<32x32xbf16>, vector<32x32xbf16>, vector<32x32xf32> -> vector<32x32xf32>
    %c0_10 = arith.constant 0 : index
    %c0_11 = arith.constant 0 : index
    %c0_12 = arith.constant 0 : index
    %13 = vector.load %arg5[%c0_10, %c0_11, %c0_12] : memref<1x1x32xf32, #tpu.memory_space<vmem>>, vector<1x1x32xf32>
    %14 = vector.shape_cast %13 : vector<1x1x32xf32> to vector<1x32xf32>
    %15 = vector.broadcast %14 : vector<1x32xf32> to vector<32x32xf32>
    %16 = arith.addf %12, %15 : vector<32x32xf32>
    %cst_13 = arith.constant 0.000000e+00 : f32
    %17 = vector.broadcast %cst_13 : f32 to vector<32x32xf32>
    %18 = arith.maximumf %16, %17 : vector<32x32xf32>
    %c0_14 = arith.constant 0 : index
    %c0_15 = arith.constant 0 : index
    %19 = vector.load %arg6[%c0_14, %c0_15] : memref<32x32xf32, #tpu.memory_space<vmem>>, vector<32x32xf32>
    tpu.vector_store %arg6[%c0_14, %c0_15], %18 {strides = array<i32>} : memref<32x32xf32, #tpu.memory_space<vmem>>, vector<32x32xf32>,
    return
  }
  func.func @transform_0(%arg0: i32) -> (i32, i32) {
    %c0_i32 = arith.constant 0 : i32
    %c0_i32_0 = arith.constant 0 : i32
    return %arg0, %c0_i32 : i32, i32
  }
  func.func @transform_1(%arg0: i32) -> (i32, i32) {
    %c0_i32 = arith.constant 0 : i32
    %c0_i32_0 = arith.constant 0 : i32
    %c0_i32_1 = arith.constant 0 : i32
    return %c0_i32, %c0_i32_0 : i32, i32
  }
  func.func @transform_2(%arg0: i32) -> (i32, i32) {
    %c0_i32 = arith.constant 0 : i32
    %c0_i32_0 = arith.constant 0 : i32
    %c0_i32_1 = arith.constant 0 : i32
    return %c0_i32, %c0_i32_0 : i32, i32
  }
  func.func @transform_3(%arg0: i32) -> (i32, i32, i32) {
    %c0_i32 = arith.constant 0 : i32
    %c0_i32_0 = arith.constant 0 : i32
    %c0_i32_1 = arith.constant 0 : i32
    %c0_i32_2 = arith.constant 0 : i32
    return %c0_i32, %c0_i32_0, %c0_i32_1 : i32, i32, i32
  }
  func.func @transform_4(%arg0: i32) -> (i32, i32, i32) {
    %c0_i32 = arith.constant 0 : i32
    %c0_i32_0 = arith.constant 0 : i32
    %c0_i32_1 = arith.constant 0 : i32
    %c0_i32_2 = arith.constant 0 : i32
    return %c0_i32, %c0_i32_0, %c0_i32_1 : i32, i32, i32
  }
  func.func @transform_5(%arg0: i32) -> (i32, i32) {
    %c0_i32 = arith.constant 0 : i32
    %c0_i32_0 = arith.constant 0 : i32
    return %arg0, %c0_i32 : i32, i32
  }
}

</mosaic_0001>

<bundles_post_ra>
// kernel: tpu_custom_call.1
= control target key start
LH: loop header
LB: loop body
LE: loop exit
PB: predicated region body
PF: predicated region fallthrough
CT: control target
= control target key end

     0   :  { %vm43_vm0 = vcmask 1043456   ;;  %vm36_vm1 = vcmask 64512   ;;  %s342_s0 = inlined_call_operand.vmem [shape: f32[32,8], index: 0, kind: input, shape index: {}]   ;;  %s343_s1 = inlined_call_operand.vmem [shape: bf16[8,32], index: 1, kind: input, shape index: {}]   ;;  %s344_s2 = inlined_call_operand.vmem [shape: f32[1,32], index: 2, kind: input, shape index: {}]   ;;  %s345_s3 = inlined_call_operand.vmem [shape: bf16[1,32,32], index: 3, kind: input, shape index: {}]   ;;  %s346_s4 = inlined_call_operand.vmem [shape: f32[1,1,32], index: 4, kind: input, shape index: {}]   ;;  %s347_s5 = inlined_call_operand.hbm [shape: f32[32,32], index: 5, kind: output, shape index: {}]  }
   0x1   :  { %v28_v0 = vld [vmem:[%s343_s1] sm:$0xf]  ;;  %v23_v2 = vld [vmem:[%s342_s0 + $0x8] sm:$0xff]  ;;  %v24_v5 = vld [vmem:[%s342_s0 + $0x10] sm:$0xff] }
   0x2   :  { %v22_v1 = vld [vmem:[%s342_s0] sm:$0xff]  ;;  %234 = vmatprep.subr.msk.bf16.mxu0 %vm43_vm0, %v28_v0  ;;  %v45_v3 = vsel %vm43_vm0, %v28_v0, 0  ;;  %v25_v6 = vld [vmem:[%s342_s0 + $0x18] sm:$0xff] }
   0x3   :  { %v26_v4 = vpack.c.bf16 %v23_v2, %v22_v1  ;;  %221 = vmatpush3.bf16.msra.mxu0 %v45_v3  ;;  %v27_v7 = vpack.c.bf16 %v25_v6, %v24_v5 }
   0x5   :  { %222 = vmatprep.mubr.msk.bf16.mxu0 %vm36_vm1, %v26_v4 }
   0x6   :  { %10 = vsyncpa [#allocation3], 0  ;;  %223 = vmatmul.mubr.msk.bf16.vlgmr.msra.gmra.mrb[0].mxu0 %vm36_vm1, %v27_v7  ;;  %v238_v8 = vld [vmem:[%s345_s3] sm:$0xff]   ;;  %v239_v9 = vld [vmem:[%s345_s3 + $0x8] sm:$0xff]   ;;  %vm125_vm2 = vcmask 261120   ;;  %s264_s3 = smov [#allocation2]  }
   0x7   :  { %226 = vmatprep.subr.bf16.mxu1 %v238_v8  ;;  %v205_v10 = vld [vmem:[%s344_s2] ss:$0 sm:$0xff]  ;;  %s194_s8 = sshll.u32 %s264_s3, 4  ;;  %s195_s8 = int_to_ptr.vmem [resolvable:$true] %s194_s8 }
   0x8   :  { %227 = vmatpush3.bf16.msra.mxu1 %v238_v8  ;;  %v208_v25 = vld [vmem:[%s346_s4] ss:$0 sm:$0xff]  ;;  %s240_s4 = scalar_lea.vmem %s195_s8, 512  ;;  %p245_p1 = scmp.lt.s32.totalorder %s195_s8, %s195_s8 }
   0x9   :  { %228 = vmatprep.subr.bf16.mxu1 %v239_v9  ;;  %p241_p0 = scmp.ne.s32.totalorder %s195_s8, %s240_s4  ;;  %p246_p2 = scmp.lt.s32.totalorder %s240_s4, %s240_s4 }
   0xb   :  { %p247_p3 = por %p246_p2, %p245_p1 }
   0xc   :  { %229 = vmatpush3.bf16.msra.mxu1 %v239_v9 }
   0xd   :  { %p248_p4 = pnand %p247_p3, %p241_p0 }
  0xd9   :  { %v224_v11 = vpop.f32.mrb[0].mxu0 }
  0xda   :  { %v90_v12 = vadd.f32 %v224_v11, %v205_v10  ;;  %v81_v13 = vpop.f32.mrb[1].mxu0 }
  0xdb   :  { %v82_v14 = vadd.f32 %v205_v10, %v81_v13  ;;  %v225_v15 = vpop.f32.mrb[2].mxu0 }
  0xdc   :  { %v93_v16 = vadd.f32 %v225_v15, %v205_v10  ;;  %v84_v17 = vpop.f32.mrb[3].mxu0  ;;  %v98_v19 = vmax.f32 %v90_v12, 0.0 }
  0xdd   :  { %v85_v18 = vadd.f32 %v205_v10, %v84_v17  ;;  %v96_v21 = vmax.f32 %v82_v14, 0.0 }
  0xde   :  { %v99_v20 = vmax.f32 %v93_v16, 0.0 }
  0xdf   :  { %v97_v22 = vmax.f32 %v85_v18, 0.0 }
  0xe0   :  { %v101_v23 = vpack.c.bf16 %v99_v20, %v98_v19 }
  0xe1   :  { %v100_v24 = vpack.c.bf16 %v97_v22, %v96_v21 }
  0xe3   :  { %230 = vmatprep.mubr.msk.bf16.mxu1 %vm125_vm2, %v100_v24 }
  0xe4   :  { %231 = vmatmul.mubr.msk.bf16.vlgmr.msra.gmra.mrb[0].mxu1 %vm125_vm2, %v101_v23 }
 0x1b7   :  { %v232_v26 = vpop.f32.mrb[0].mxu1 }
 0x1b8   :  { %v175_v27 = vadd.f32 %v232_v26, %v208_v25  ;;  %v166_v28 = vpop.f32.mrb[1].mxu1 }
 0x1b9   :  { %v167_v29 = vadd.f32 %v208_v25, %v166_v28  ;;  %v233_v30 = vpop.f32.mrb[2].mxu1 }
 0x1ba   :  { %v183_v31 = vmax.f32 %v175_v27, 0.0  ;;  %v178_v32 = vadd.f32 %v233_v30, %v208_v25  ;;  %v169_v33 = vpop.f32.mrb[3].mxu1 }
 0x1bb   :  { %v181_v34 = vmax.f32 %v167_v29, 0.0  ;;  %v170_v35 = vadd.f32 %v208_v25, %v169_v33 }
 0x1bc   :  { %187 = vst.msk [vmem:[#allocation2 + $0x10] sm:$0xff] %vm125_vm2, %v183_v31  ;;  %v184_v36 = vmax.f32 %v178_v32, 0.0 }
 0x1bd   :  { %185 = vst.msk [vmem:[#allocation2] sm:$0xff] %vm125_vm2, %v181_v34  ;;  %v182_v37 = vmax.f32 %v170_v35, 0.0 }
 0x1be   :  { %188 = vst.msk [vmem:[#allocation2 + $0x18] sm:$0xff] %vm125_vm2, %v184_v36 }
 0x1bf   :  { %186 = vst.msk [vmem:[#allocation2 + $0x8] sm:$0xff] %vm125_vm2, %v182_v37 }
 0x1c0   :  { %251 = shalt.err (!%p248_p4)
}
 0x1c1   :  { %s252_s11 = scalar_lea.hbm %s347_s5, 512 }
 0x1c2   :  { %p253_p5 = scmp.ne.s32.totalorder %s347_s5, %s252_s11  ;;  %p256_p6 = scmp.lt.u32.totalorder %s252_s11, %s347_s5 }
 0x1c4   :  { %p258_p7 = pnand %p256_p6, %p253_p5 }
 0x1c6   :  { %261 = shalt.err (!%p258_p7)
}
 0x1c7   :  { %s265_s16 = smov 128   ;;  %s266_s17 = smov 8  }
 0x1c8   :  { %200 = dma.vmem_to_hbm [thread:$0]  %s195_s8, 512, %s347_s5, [#allocation3], %s265_s16, %s265_s16, %s266_s17  }
 0x1c9   :  { %262 = dma.done.wait [#allocation3], 512  }
 0x1ca   :  { %263 = vsyncadd [#allocation3], 4294966784 }
 0x1cb   :  { %204 = vsyncpa [#allocation3], 1 }

</bundles_post_ra>
